<compile_context>
chip_gen: v7x
topology: tpu7x:2x2x1
jax: 0.10.0
libtpu: 0.0.40
codegen_flags: <defaults>
</compile_context>

<pallas_src>
import functools

import jax
import jax.numpy as jnp
from jax.experimental import pallas as pl
from jax.experimental.pallas import tpu as pltpu

_EPS = 1e-8  # torch.nn.functional.cosine_similarity default eps


def _fold_to_128(v):
    """Sum a (C, W) tile down to (C, 128) per-lane partial sums.

    W is always a power-of-two multiple of 128 (guaranteed by the wrapper), so
    every step is a lane-aligned slice + elementwise VPU add (no XLU work).
    """
    w = v.shape[1]
    while w > 128:
        h = w // 2
        v = v[:, :h] + v[:, h:]
        w = h
    return v


def _content_loss_kernel(x_ref, t_ref, dot_ref, xsq_ref, tsq_ref, *,
                         blocks_per_split, total_blocks, block_n, n_total,
                         phantom):
    s = pl.program_id(0)              # N-half (parallel axis; 2 TCs on v7x)
    kn = pl.program_id(1)             # reduction step within the half
    gb = s * blocks_per_split + kn    # global block index along N
    last = total_blocks - 1

    @pl.when(kn == 0)
    def _init():
        dot_ref[...] = jnp.zeros_like(dot_ref)
        xsq_ref[...] = jnp.zeros_like(xsq_ref)
        tsq_ref[...] = jnp.zeros_like(tsq_ref)

    def _accum(xf, tf):
        dot_ref[...] += _fold_to_128(xf * tf)
        xsq_ref[...] += _fold_to_128(xf * xf)
        tsq_ref[...] += _fold_to_128(tf * tf)

    ragged = (n_total % block_n) != 0

    if ragged:
        # Steady-state path: no mask work at all.
        @pl.when(gb < last)
        def _steady():
            _accum(x_ref[...].astype(jnp.float32),
                   t_ref[...].astype(jnp.float32))

        # Tail path: mask the columns past N (only on the last real block).
        @pl.when(gb == last)
        def _tail():
            col = last * block_n + jax.lax.broadcasted_iota(
                jnp.int32, x_ref.shape, 1)
            valid = col < n_total
            xf = jnp.where(valid, x_ref[...].astype(jnp.float32), 0.0)
            tf = jnp.where(valid, t_ref[...].astype(jnp.float32), 0.0)
            _accum(xf, tf)
    elif phantom:
        # Rectangular grid over an odd block count: skip the padding step.
        @pl.when(gb <= last)
        def _steady():
            _accum(x_ref[...].astype(jnp.float32),
                   t_ref[...].astype(jnp.float32))
    else:
        _accum(x_ref[...].astype(jnp.float32),
               t_ref[...].astype(jnp.float32))


def _pow2_mult_of_128(v):
    """Largest power-of-two multiple of 128 that is <= max(v, 128)."""
    v = max(int(v), 128)
    m = 128
    while m * 2 <= v:
        m *= 2
    return m


def content_loss_forward(x, target):
    """Returns (input_passthrough, loss) matching ContentLoss.forward."""
    assert x.shape == target.shape, (x.shape, target.shape)
    c = x.shape[1]
    # Row-major reshape == torch .view(C, -1) (mixes batch for B > 1, as torch does).
    x2 = x.reshape(c, -1)
    t2 = target.reshape(c, -1)
    n = x2.shape[1]
    itemsize = jnp.dtype(x2.dtype).itemsize

    # --- chip-aware block budget / VMEM limit ---------------------------------
    try:
        vmem_cap = int(getattr(pltpu.get_tpu_info(), "vmem_capacity_bytes",
                               64 * 1024 * 1024))
    except Exception:
        vmem_cap = 64 * 1024 * 1024
    if vmem_cap >= 96 * 1024 * 1024:      # v5e / v6e: 128 MiB physical VMEM
        block_budget = 4 * 1024 * 1024
        vmem_limit = 64 * 1024 * 1024
    else:                                 # v7x: 64 MiB physical VMEM
        block_budget = 3 * 1024 * 1024
        vmem_limit = 48 * 1024 * 1024

    # --- tile sizing -----------------------------------------------------------
    n_pad128 = ((n + 127) // 128) * 128
    budget_elems = max(block_budget // max(c * itemsize, 1), 128)
    block_n = _pow2_mult_of_128(min(budget_elems, n_pad128))
    # Cap so the reduction grid has >= ~4 steps (DMA/compute pipelining), but
    # never drop below 512 lanes (per-step overhead would start to show).
    cap = max(512, _pow2_mult_of_128(pl.cdiv(n_pad128, 4)))
    block_n = min(block_n, cap)

    total_blocks = pl.cdiv(n, block_n)
    n_splits = 2 if total_blocks >= 2 else 1        # v7x: one N-half per TC
    nbps = pl.cdiv(total_blocks, n_splits)          # blocks per split
    phantom = (n_splits * nbps) != total_blocks
    last_blk = total_blocks - 1

    if phantom:
        def in_map(s, kn):
            # Clamp the padding step of the rectangular grid to an in-bounds
            # block; its accumulate is skipped inside the kernel.
            return (0, jnp.minimum(s * nbps + kn, last_blk))
    else:
        def in_map(s, kn):
            return (0, s * nbps + kn)

    out_map = lambda s, kn: (0, s)   # one lane-wide accumulator block per split

    kernel = functools.partial(
        _content_loss_kernel,
        blocks_per_split=nbps, total_blocks=total_blocks,
        block_n=block_n, n_total=n, phantom=phantom)

    acc_shape = jax.ShapeDtypeStruct((c, n_splits * 128), jnp.float32)
    dot_p, xsq_p, tsq_p = pl.pallas_call(
        kernel,
        out_shape=(acc_shape, acc_shape, acc_shape),
        grid_spec=pltpu.PrefetchScalarGridSpec(
            num_scalar_prefetch=0,
            grid=(n_splits, nbps),
            in_specs=[
                pl.BlockSpec((c, block_n), in_map),
                pl.BlockSpec((c, block_n), in_map),
            ],
            out_specs=(
                pl.BlockSpec((c, 128), out_map),
                pl.BlockSpec((c, 128), out_map),
                pl.BlockSpec((c, 128), out_map),
            ),
        ),
        compiler_params=pltpu.CompilerParams(
            dimension_semantics=("parallel", "arbitrary"),
            vmem_limit_bytes=vmem_limit,
        ),
    )(x2, t2)

    # Tiny finalize in plain XLA: fold per-lane / per-split partials, cosine.
    dot = jnp.sum(dot_p, axis=1)
    xsq = jnp.sum(xsq_p, axis=1)
    tsq = jnp.sum(tsq_p, axis=1)
    # torch.cosine_similarity: w12 / sqrt(clamp_min(w1 * w2, eps^2))
    cos = dot / jnp.sqrt(jnp.maximum(xsq * tsq, _EPS * _EPS))
    loss = (1.0 - jnp.sum(cos) / c).astype(jnp.float32)
    # forward() returns the input unchanged; loss is the side value.
    return x, loss


def _reference_loss(x, target):
    c = x.shape[1]
    x2 = x.reshape(c, -1).astype(jnp.float32)
    t2 = target.reshape(c, -1).astype(jnp.float32)
    dot = jnp.sum(x2 * t2, axis=1)
    w1 = jnp.sum(x2 * x2, axis=1)
    w2 = jnp.sum(t2 * t2, axis=1)
    cos = dot / jnp.sqrt(jnp.maximum(w1 * w2, _EPS * _EPS))
    return 1.0 - jnp.sum(cos) / c


if __name__ == "__main__":
    key = jax.random.PRNGKey(0)
    k1, k2, k3, k4, k5, k6 = jax.random.split(key, 6)

    # Case 1: small NCHW, batch=2, channels=4, spatial=16 (N = 512, exact tile).
    x = jax.random.normal(k1, (2, 4, 16, 16), dtype=jnp.float32)
    target = jax.random.normal(k2, (2, 4, 16, 16), dtype=jnp.float32)
    out, loss = content_loss_forward(x, target)
    out = jax.block_until_ready(out)
    loss = jax.block_until_ready(loss)
    assert out.shape == x.shape and bool(jnp.all(out == x))
    ref = _reference_loss(x, target)
    assert bool(jnp.allclose(loss, ref, rtol=1e-4, atol=1e-4)), (loss, ref)

    # Case 2: ragged N (single partial block -> masked tail path) + bf16.
    xb = jax.random.normal(k3, (1, 8, 5, 7), dtype=jnp.bfloat16)
    tb = jax.random.normal(k4, (1, 8, 5, 7), dtype=jnp.bfloat16)
    out_b, loss_b = content_loss_forward(xb, tb)
    out_b = jax.block_until_ready(out_b)
    loss_b = jax.block_until_ready(loss_b)
    assert out_b.shape == xb.shape and bool(jnp.all(out_b == xb))
    ref_b = _reference_loss(xb, tb)
    assert bool(jnp.allclose(loss_b, ref_b, rtol=2e-3, atol=2e-3)), (loss_b, ref_b)

    # Case 3: multiple blocks, 2-way N split, ragged tail in the second half.
    xc = jax.random.normal(k5, (1, 16, 24, 24), dtype=jnp.float32)
    tc = jax.random.normal(k6, (1, 16, 24, 24), dtype=jnp.float32)
    out_c, loss_c = content_loss_forward(xc, tc)
    out_c = jax.block_until_ready(out_c)
    loss_c = jax.block_until_ready(loss_c)
    assert out_c.shape == xc.shape and bool(jnp.all(out_c == xc))
    ref_c = _reference_loss(xc, tc)
    assert bool(jnp.allclose(loss_c, ref_c, rtol=1e-4, atol=1e-4)), (loss_c, ref_c)

    print("KERNEL_OK")
</pallas_src>

<mosaic_0001>
module attributes {stable_mosaic.version = 11 : i64} {
  func.func @_content_loss_kernel(%arg0: i32, %arg1: i32, %arg2: memref<4x512xf32, #tpu.memory_space<vmem>>, %arg3: memref<4x512xf32, #tpu.memory_space<vmem>>, %arg4: memref<4x128xf32, #tpu.memory_space<vmem>>, %arg5: memref<4x128xf32, #tpu.memory_space<vmem>>, %arg6: memref<4x128xf32, #tpu.memory_space<vmem>>) attributes {dimension_semantics = [#tpu.dimension_semantics<parallel>, #tpu.dimension_semantics<arbitrary>], iteration_bounds = array<i64: 1, 1>, scalar_prefetch = 0 : i64, scratch_operands = 0 : i64, tpu.core_type = #tpu.core_type<tc>, window_params = [{transform_indices = @transform_0, window_bounds = array<i64: 4, 512>}, {transform_indices = @transform_1, window_bounds = array<i64: 4, 512>}, {transform_indices = @transform_2, window_bounds = array<i64: 4, 128>}, {transform_indices = @transform_3, window_bounds = array<i64: 4, 128>}, {transform_indices = @transform_4, window_bounds = array<i64: 4, 128>}]} {
    %c0_i32 = arith.constant 0 : i32
    %0 = arith.cmpi eq, %arg1, %c0_i32 : i32
    %1 = arith.extui %0 : i1 to i32
    %c0_i32_0 = arith.constant 0 : i32
    %2 = arith.cmpi ne, %1, %c0_i32_0 : i32
    scf.if %2 {
      %cst = arith.constant 0.000000e+00 : f32
      %35 = vector.broadcast %cst : f32 to vector<4x128xf32>
      %c0_16 = arith.constant 0 : index
      %c0_17 = arith.constant 0 : index
      %36 = vector.load %arg4[%c0_16, %c0_17] : memref<4x128xf32, #tpu.memory_space<vmem>>, vector<4x128xf32>
      tpu.vector_store %arg4[%c0_16, %c0_17], %35 {strides = array<i32>} : memref<4x128xf32, #tpu.memory_space<vmem>>, vector<4x128xf32>,
      %cst_18 = arith.constant 0.000000e+00 : f32
      %37 = vector.broadcast %cst_18 : f32 to vector<4x128xf32>
      %c0_19 = arith.constant 0 : index
      %c0_20 = arith.constant 0 : index
      %38 = vector.load %arg5[%c0_19, %c0_20] : memref<4x128xf32, #tpu.memory_space<vmem>>, vector<4x128xf32>
      tpu.vector_store %arg5[%c0_19, %c0_20], %37 {strides = array<i32>} : memref<4x128xf32, #tpu.memory_space<vmem>>, vector<4x128xf32>,
      %cst_21 = arith.constant 0.000000e+00 : f32
      %39 = vector.broadcast %cst_21 : f32 to vector<4x128xf32>
      %c0_22 = arith.constant 0 : index
      %c0_23 = arith.constant 0 : index
      %40 = vector.load %arg6[%c0_22, %c0_23] : memref<4x128xf32, #tpu.memory_space<vmem>>, vector<4x128xf32>
      tpu.vector_store %arg6[%c0_22, %c0_23], %39 {strides = array<i32>} : memref<4x128xf32, #tpu.memory_space<vmem>>, vector<4x128xf32>,
    } else {
    }
    %c0 = arith.constant 0 : index
    %c0_1 = arith.constant 0 : index
    %3 = vector.load %arg2[%c0, %c0_1] : memref<4x512xf32, #tpu.memory_space<vmem>>, vector<4x512xf32>
    %c0_2 = arith.constant 0 : index
    %c0_3 = arith.constant 0 : index
    %4 = vector.load %arg3[%c0_2, %c0_3] : memref<4x512xf32, #tpu.memory_space<vmem>>, vector<4x512xf32>
    %c0_4 = arith.constant 0 : index
    %c0_5 = arith.constant 0 : index
    %5 = vector.load %arg4[%c0_4, %c0_5] : memref<4x128xf32, #tpu.memory_space<vmem>>, vector<4x128xf32>
    %6 = arith.mulf %3, %4 : vector<4x512xf32>
    %7 = vector.extract_strided_slice %6 {offsets = [0, 0], sizes = [4, 256], strides = [1, 1]} : vector<4x512xf32> to vector<4x256xf32>
    %8 = vector.extract_strided_slice %6 {offsets = [0, 256], sizes = [4, 256], strides = [1, 1]} : vector<4x512xf32> to vector<4x256xf32>
    %9 = arith.addf %7, %8 : vector<4x256xf32>
    %10 = vector.extract_strided_slice %9 {offsets = [0, 0], sizes = [4, 128], strides = [1, 1]} : vector<4x256xf32> to vector<4x128xf32>
    %11 = vector.extract_strided_slice %9 {offsets = [0, 128], sizes = [4, 128], strides = [1, 1]} : vector<4x256xf32> to vector<4x128xf32>
    %12 = arith.addf %10, %11 : vector<4x128xf32>
    %13 = arith.addf %5, %12 : vector<4x128xf32>
    %c0_6 = arith.constant 0 : index
    %c0_7 = arith.constant 0 : index
    %14 = vector.load %arg4[%c0_6, %c0_7] : memref<4x128xf32, #tpu.memory_space<vmem>>, vector<4x128xf32>
    tpu.vector_store %arg4[%c0_6, %c0_7], %13 {strides = array<i32>} : memref<4x128xf32, #tpu.memory_space<vmem>>, vector<4x128xf32>,
    %c0_8 = arith.constant 0 : index
    %c0_9 = arith.constant 0 : index
    %15 = vector.load %arg5[%c0_8, %c0_9] : memref<4x128xf32, #tpu.memory_space<vmem>>, vector<4x128xf32>
    %16 = arith.mulf %3, %3 : vector<4x512xf32>
    %17 = vector.extract_strided_slice %16 {offsets = [0, 0], sizes = [4, 256], strides = [1, 1]} : vector<4x512xf32> to vector<4x256xf32>
    %18 = vector.extract_strided_slice %16 {offsets = [0, 256], sizes = [4, 256], strides = [1, 1]} : vector<4x512xf32> to vector<4x256xf32>
    %19 = arith.addf %17, %18 : vector<4x256xf32>
    %20 = vector.extract_strided_slice %19 {offsets = [0, 0], sizes = [4, 128], strides = [1, 1]} : vector<4x256xf32> to vector<4x128xf32>
    %21 = vector.extract_strided_slice %19 {offsets = [0, 128], sizes = [4, 128], strides = [1, 1]} : vector<4x256xf32> to vector<4x128xf32>
    %22 = arith.addf %20, %21 : vector<4x128xf32>
    %23 = arith.addf %15, %22 : vector<4x128xf32>
    %c0_10 = arith.constant 0 : index
    %c0_11 = arith.constant 0 : index
    %24 = vector.load %arg5[%c0_10, %c0_11] : memref<4x128xf32, #tpu.memory_space<vmem>>, vector<4x128xf32>
    tpu.vector_store %arg5[%c0_10, %c0_11], %23 {strides = array<i32>} : memref<4x128xf32, #tpu.memory_space<vmem>>, vector<4x128xf32>,
    %c0_12 = arith.constant 0 : index
    %c0_13 = arith.constant 0 : index
    %25 = vector.load %arg6[%c0_12, %c0_13] : memref<4x128xf32, #tpu.memory_space<vmem>>, vector<4x128xf32>
    %26 = arith.mulf %4, %4 : vector<4x512xf32>
    %27 = vector.extract_strided_slice %26 {offsets = [0, 0], sizes = [4, 256], strides = [1, 1]} : vector<4x512xf32> to vector<4x256xf32>
    %28 = vector.extract_strided_slice %26 {offsets = [0, 256], sizes = [4, 256], strides = [1, 1]} : vector<4x512xf32> to vector<4x256xf32>
    %29 = arith.addf %27, %28 : vector<4x256xf32>
    %30 = vector.extract_strided_slice %29 {offsets = [0, 0], sizes = [4, 128], strides = [1, 1]} : vector<4x256xf32> to vector<4x128xf32>
    %31 = vector.extract_strided_slice %29 {offsets = [0, 128], sizes = [4, 128], strides = [1, 1]} : vector<4x256xf32> to vector<4x128xf32>
    %32 = arith.addf %30, %31 : vector<4x128xf32>
    %33 = arith.addf %25, %32 : vector<4x128xf32>
    %c0_14 = arith.constant 0 : index
    %c0_15 = arith.constant 0 : index
    %34 = vector.load %arg6[%c0_14, %c0_15] : memref<4x128xf32, #tpu.memory_space<vmem>>, vector<4x128xf32>
    tpu.vector_store %arg6[%c0_14, %c0_15], %33 {strides = array<i32>} : memref<4x128xf32, #tpu.memory_space<vmem>>, vector<4x128xf32>,
    return
  }
  func.func @transform_0(%arg0: i32, %arg1: i32) -> (i32, i32) {
    %c1_i32 = arith.constant 1 : i32
    %0 = arith.muli %arg0, %c1_i32 : i32
    %1 = arith.addi %0, %arg1 : i32
    %c0_i32 = arith.constant 0 : i32
    %c0_i32_0 = arith.constant 0 : i32
    return %c0_i32, %1 : i32, i32
  }
  func.func @transform_1(%arg0: i32, %arg1: i32) -> (i32, i32) {
    %c1_i32 = arith.constant 1 : i32
    %0 = arith.muli %arg0, %c1_i32 : i32
    %1 = arith.addi %0, %arg1 : i32
    %c0_i32 = arith.constant 0 : i32
    %c0_i32_0 = arith.constant 0 : i32
    return %c0_i32, %1 : i32, i32
  }
  func.func @transform_2(%arg0: i32, %arg1: i32) -> (i32, i32) {
    %c0_i32 = arith.constant 0 : i32
    %c0_i32_0 = arith.constant 0 : i32
    return %c0_i32, %arg0 : i32, i32
  }
  func.func @transform_3(%arg0: i32, %arg1: i32) -> (i32, i32) {
    %c0_i32 = arith.constant 0 : i32
    %c0_i32_0 = arith.constant 0 : i32
    return %c0_i32, %arg0 : i32, i32
  }
  func.func @transform_4(%arg0: i32, %arg1: i32) -> (i32, i32) {
    %c0_i32 = arith.constant 0 : i32
    %c0_i32_0 = arith.constant 0 : i32
    return %c0_i32, %arg0 : i32, i32
  }
}

</mosaic_0001>

<bundles_post_ra>
// kernel: tpu_custom_call.1
= control target key start
LH: loop header
LB: loop body
LE: loop exit
PB: predicated region body
PF: predicated region fallthrough
CT: control target
= control target key end

     0   :  { %10 = vsyncpa [#allocation3], 0  ;;  %s365_s0 = inlined_call_operand.hbm [shape: f32[4,512], index: 0, kind: input, shape index: {}]   ;;  %s366_s1 = inlined_call_operand.hbm [shape: f32[4,512], index: 1, kind: input, shape index: {}]   ;;  %s367_s2 = inlined_call_operand.hbm [shape: f32[4,128], index: 2, kind: output, shape index: {0}]   ;;  %s368_s3 = inlined_call_operand.hbm [shape: f32[4,128], index: 3, kind: output, shape index: {1}]   ;;  %s369_s4 = inlined_call_operand.hbm [shape: f32[4,128], index: 4, kind: output, shape index: {2}]  }
   0x1   :  { %11 = vsyncpa [#allocation6], 0 }
   0x2   :  { %12 = vsyncpa [#allocation4], 0 }
   0x3   :  { %13 = vsyncpa [#allocation9], 0  ;;  %s260_s15 = smov [#allocation2]   ;;  %s261_s17 = smov [#allocation5]  }
   0x4   :  { %s24_s16 = sshll.u32 %s260_s15, 4  ;;  %s38_s18 = sshll.u32 %s261_s17, 4  ;;  %s25_s16 = int_to_ptr.vmem [resolvable:$true] %s24_s16  ;;  %s39_s18 = int_to_ptr.vmem [resolvable:$true] %s38_s18 }
   0x5   :  { %s142_s21 = scalar_lea.hbm %s365_s0, 256 }
   0x6   :  { %p143_p0 = scmp.ne.s32.totalorder %s365_s0, %s142_s21  ;;  %p146_p1 = scmp.lt.u32.totalorder %s142_s21, %s365_s0 }
   0x8   :  { %p148_p2 = pnand %p146_p1, %p143_p0 }
   0xa   :  { %151 = shalt.err (!%p148_p2)
}
   0xb   :  { %s152_s26 = scalar_lea.vmem %s25_s16, 256  ;;  %p157_p4 = scmp.lt.s32.totalorder %s25_s16, %s25_s16 }
   0xc   :  { %p153_p3 = scmp.ne.s32.totalorder %s25_s16, %s152_s26  ;;  %p158_p5 = scmp.lt.s32.totalorder %s152_s26, %s152_s26 }
   0xe   :  { %p159_p6 = por %p158_p5, %p157_p4 }
  0x10   :  { %p160_p7 = pnand %p159_p6, %p153_p3 }
  0x12   :  { %163 = shalt.err (!%p160_p7)
}
  0x13   :  { %27 = dma.hbm_to_vmem [thread:$0]  %s365_s0, 256, %s25_s16, [#allocation3]  }
  0x14   :  { %s164_s5 = scalar_lea.hbm %s366_s1, 256 }
  0x15   :  { %p165_p8 = scmp.ne.s32.totalorder %s366_s1, %s164_s5  ;;  %p168_p9 = scmp.lt.u32.totalorder %s164_s5, %s366_s1 }
  0x17   :  { %p170_p10 = pnand %p168_p9, %p165_p8 }
  0x19   :  { %173 = shalt.err (!%p170_p10)
}
  0x1a   :  { %s174_s10 = scalar_lea.vmem %s39_s18, 256  ;;  %p179_p12 = scmp.lt.s32.totalorder %s39_s18, %s39_s18 }
  0x1b   :  { %p175_p11 = scmp.ne.s32.totalorder %s39_s18, %s174_s10  ;;  %p180_p13 = scmp.lt.s32.totalorder %s174_s10, %s174_s10 }
  0x1d   :  { %p181_p0 = por %p180_p13, %p179_p12 }
  0x1f   :  { %p182_p1 = pnand %p181_p0, %p175_p11 }
  0x21   :  { %185 = shalt.err (!%p182_p1)
}
  0x22   :  { %41 = dma.hbm_to_vmem [thread:$0]  %s366_s1, 256, %s39_s18, [#allocation6]  }
  0x23   :  { %252 = dma.done.wait [#allocation3], 256  }
  0x24   :  { %253 = vsyncadd [#allocation3], 4294967040 }
  0x25   :  { %254 = dma.done.wait [#allocation6], 256  }
  0x26   :  { %255 = vsyncadd [#allocation6], 4294967040  ;;  %v262_v0 = vmov 0.0   ;;  %v59_v1 = vld [vmem:[#allocation2] sm:$0xff]  ;;  %v60_v2 = vld [vmem:[#allocation2 + $0x8] sm:$0xff]  ;;  %s263_s1 = smov [#allocation8]  }
  0x27   :  { %57 = vst [vmem:[#allocation8] sm:$0xf] %v262_v0  ;;  %56 = vst [vmem:[#allocation7] sm:$0xf] %v262_v0  ;;  %v61_v3 = vld [vmem:[#allocation5] sm:$0xff]  ;;  %v74_v4 = vmul.f32 %v59_v1, %v59_v1  ;;  %v75_v5 = vmul.f32 %v60_v2, %v60_v2  ;;  %v62_v6 = vld [vmem:[#allocation5 + $0x8] sm:$0xff] }
  0x28   :  { %58 = vst [vmem:[#allocation10] sm:$0xf] %v262_v0  ;;  %v64_v7 = vmul.f32 %v61_v3, %v59_v1  ;;  %v84_v8 = vmul.f32 %v61_v3, %v61_v3  ;;  %v65_v9 = vmul.f32 %v62_v6, %v60_v2  ;;  %v85_v10 = vmul.f32 %v62_v6, %v62_v6  ;;  %s109_s12 = sshll.u32 %s263_s1, 4  ;;  %s264_s13 = smov [#allocation7]   ;;  %s110_s12 = int_to_ptr.vmem [resolvable:$true] %s109_s12 }
  0x29   :  { %v76_v11 = vadd.f32 %v75_v5, %v74_v4  ;;  %s99_s14 = sshll.u32 %s264_s13, 4  ;;  %s265_s15 = smov [#allocation10]   ;;  %s315_s14 = int_to_ptr.vmem [resolvable:$true] %s99_s14 }
  0x2a   :  { %v66_v12 = vadd.f32 %v65_v9, %v64_v7  ;;  %v86_v13 = vadd.f32 %v85_v10, %v84_v8  ;;  %s119_s16 = sshll.u32 %s265_s15, 4  ;;  %s186_s17 = scalar_lea.vmem %s110_s12, 64  ;;  %s317_s16 = int_to_ptr.vmem [resolvable:$true] %s119_s16 }
  0x2b   :  { %v78_v14 = vrot.slane %v76_v11, 4  ;;  %p187_p2 = scmp.ne.s32.totalorder %s110_s12, %s186_s17  ;;  %p191_p3 = scmp.lt.s32.totalorder %s110_s12, %s110_s12 }
  0x2c   :  { %v68_v16 = vrot.slane %v66_v12, 4  ;;  %v88_v17 = vrot.slane %v86_v13, 4  ;;  %p192_p4 = scmp.lt.s32.totalorder %s186_s17, %s186_s17 }
  0x2d   :  { %v80_v18 = vadd.f32 %v78_v14, %v76_v11 }
  0x2e   :  { %v73_v15 = vld [vmem:[#allocation8] sm:$0xf]  ;;  %v63_v19 = vld [vmem:[#allocation7] sm:$0xf]  ;;  %v70_v21 = vadd.f32 %v68_v16, %v66_v12  ;;  %v90_v22 = vadd.f32 %v88_v17, %v86_v13  ;;  %p193_p5 = por %p192_p4, %p191_p3 }
  0x2f   :  { %v83_v20 = vld [vmem:[#allocation10] sm:$0xf]  ;;  %v81_v23 = vadd.f32 %v80_v18, %v73_v15 }
  0x30   :  { %v71_v24 = vadd.f32 %v70_v21, %v63_v19  ;;  %v91_v25 = vadd.f32 %v90_v22, %v83_v20  ;;  %p194_p6 = pnand %p193_p5, %p187_p2 }
  0x31   :  { %82 = vst [vmem:[#allocation8] sm:$0xf] %v81_v23 }
  0x32   :  { %72 = vst [vmem:[#allocation7] sm:$0xf] %v71_v24  ;;  %92 = vst [vmem:[#allocation10] sm:$0xf] %v91_v25 }
  0x33   :  { %197 = shalt.err (!%p194_p6)
}
  0x34   :  { %s198_s20 = scalar_lea.hbm %s368_s3, 64 }
  0x35   :  { %p199_p7 = scmp.ne.s32.totalorder %s368_s3, %s198_s20  ;;  %p202_p8 = scmp.lt.u32.totalorder %s198_s20, %s368_s3 }
  0x37   :  { %p204_p9 = pnand %p202_p8, %p199_p7 }
  0x39   :  { %207 = shalt.err (!%p204_p9)
}
  0x3a   :  { %112 = dma.vmem_to_hbm [thread:$0]  %s110_s12, 64, %s368_s3, [#allocation9]  }
  0x3b   :  { %s208_s27 = scalar_lea.vmem %s315_s14, 64  ;;  %p213_p11 = scmp.lt.s32.totalorder %s315_s14, %s315_s14 }
  0x3c   :  { %p209_p10 = scmp.ne.s32.totalorder %s315_s14, %s208_s27  ;;  %p214_p12 = scmp.lt.s32.totalorder %s208_s27, %s208_s27 }
  0x3e   :  { %p215_p13 = por %p214_p12, %p213_p11 }
  0x40   :  { %p216_p0 = pnand %p215_p13, %p209_p10 }
  0x42   :  { %219 = shalt.err (!%p216_p0)
}
  0x43   :  { %s220_s30 = scalar_lea.hbm %s367_s2, 64 }
  0x44   :  { %p221_p1 = scmp.ne.s32.totalorder %s367_s2, %s220_s30  ;;  %p224_p2 = scmp.lt.u32.totalorder %s220_s30, %s367_s2 }
  0x46   :  { %p226_p3 = pnand %p224_p2, %p221_p1 }
  0x48   :  { %229 = shalt.err (!%p226_p3)
}
  0x49   :  { %102 = dma.vmem_to_hbm [thread:$0]  %s315_s14, 64, %s367_s2, [#allocation4]  }
  0x4a   :  { %s230_s10 = scalar_lea.vmem %s317_s16, 64  ;;  %p235_p5 = scmp.lt.s32.totalorder %s317_s16, %s317_s16 }
  0x4b   :  { %p231_p4 = scmp.ne.s32.totalorder %s317_s16, %s230_s10  ;;  %p236_p6 = scmp.lt.s32.totalorder %s230_s10, %s230_s10 }
  0x4d   :  { %p237_p7 = por %p236_p6, %p235_p5 }
  0x4f   :  { %p238_p8 = pnand %p237_p7, %p231_p4 }
  0x51   :  { %241 = shalt.err (!%p238_p8)
}
  0x52   :  { %s242_s1 = scalar_lea.hbm %s369_s4, 64 }
  0x53   :  { %p243_p9 = scmp.ne.s32.totalorder %s369_s4, %s242_s1  ;;  %p246_p10 = scmp.lt.u32.totalorder %s242_s1, %s369_s4 }
  0x55   :  { %p248_p11 = pnand %p246_p10, %p243_p9 }
  0x57   :  { %251 = shalt.err (!%p248_p11)
}
  0x58   :  { %122 = dma.vmem_to_hbm [thread:$0]  %s317_s16, 64, %s369_s4, [#allocation9]  }
  0x59   :  { %256 = dma.done.wait [#allocation4], 64  }
  0x5a   :  { %257 = vsyncadd [#allocation4], 4294967232 }
  0x5b   :  { %258 = dma.done.wait [#allocation9], 128  }
  0x5c   :  { %259 = vsyncadd [#allocation9], 4294967168 }
  0x5d   :  { %132 = vsyncpa [#allocation3], 1 }
  0x5e   :  { %133 = vsyncpa [#allocation6], 1 }
  0x5f   :  { %134 = vsyncpa [#allocation4], 1 }
  0x60   :  { %135 = vsyncpa [#allocation9], 1 }

</bundles_post_ra>
